<compile_context>
chip_gen: v7x
topology: tpu7x:2x2x1
jax: 0.10.0
libtpu: 0.0.40
codegen_flags: <defaults>
</compile_context>

<pallas_src>
import functools

import jax
import jax.numpy as jnp
from jax.experimental import pallas as pl
from jax.experimental.pallas import tpu as pltpu


def _gelu_exact(x):
    # nn.GELU() default = exact erf-based GELU.
    return 0.5 * x * (1.0 + jax.lax.erf(x * (1.0 / jnp.sqrt(2.0))))


def projection_head_kernel(x_ref, w1_ref, w2_ref, params_ref, o_ref, *, eps):
    # params: (4, P) f32 -> b1, b2, gamma, beta
    params = params_ref[...]
    b1 = params[0:1, :]
    b2 = params[1:2, :]
    gamma = params[2:3, :]
    beta = params[3:4, :]

    # projection = x @ W1 + b1   (native-dtype MXU matmul, f32 accumulate)
    projected = jnp.dot(x_ref[...], w1_ref[...],
                        preferred_element_type=jnp.float32) + b1     # (tm, P) f32

    # h = GELU(projected) @ W2 + b2  (epilogue in f32, matmul in W2's dtype)
    h = _gelu_exact(projected)
    h = jnp.dot(h.astype(w2_ref.dtype), w2_ref[...],
                preferred_element_type=jnp.float32) + b2             # (tm, P) f32

    # dropout(p=0.0) is identity; residual uses the pre-GELU activations.
    y = h + projected

    # LayerNorm over last dim (biased variance, eps inside rsqrt; PyTorch-style).
    mean = jnp.mean(y, axis=-1, keepdims=True)
    yc = y - mean
    var = jnp.mean(yc * yc, axis=-1, keepdims=True)
    out = yc * jax.lax.rsqrt(var + eps) * gamma + beta

    o_ref[...] = out.astype(o_ref.dtype)


def projection_head(x, w1, b1, w2, b2, gamma, beta, *, eps=1e-5, tm=256):
    """x: [B, E]; w1: [E, P]; w2: [P, P]; b1,b2,gamma,beta: [P] -> out [B, P]."""
    B, E = x.shape
    Ew, P = w1.shape
    assert Ew == E and w2.shape == (P, P)

    # ---- M tiling: clamp to (padded) batch, keep a multiple of 8, pad batch. --
    tm = max(8, min((int(tm) // 8) * 8, ((B + 7) // 8) * 8))
    B_pad = ((B + tm - 1) // tm) * tm
    if B_pad != B:
        x = jnp.pad(x, ((0, B_pad - B), (0, 0)))

    # ---- K padding: make the first contraction lane-dense (multiple of 128). --
    E_pad = ((E + 127) // 128) * 128
    if E_pad != E:
        x = jnp.pad(x, ((0, 0), (0, E_pad - E)))
        w1 = jnp.pad(w1, ((0, E_pad - E), (0, 0)))

    # ---- Pack the four per-channel vectors into one (4, P) f32 operand. -------
    params = jnp.stack([b1, b2, gamma, beta]).astype(jnp.float32)

    out_dtype = x.dtype
    out_itemsize = jnp.dtype(out_dtype).itemsize
    grid_m = B_pad // tm

    cost = pl.CostEstimate(
        flops=2 * B_pad * E_pad * P + 2 * B_pad * P * P,
        transcendentals=B_pad * P,  # erf
        bytes_accessed=(x.size * x.dtype.itemsize
                        + w1.size * w1.dtype.itemsize
                        + w2.size * w2.dtype.itemsize
                        + params.size * 4
                        + B_pad * P * out_itemsize),
    )

    # Rough scoped-VMEM budget: double-buffered x/out tiles, resident weights,
    # packed params, plus headroom for the f32 epilogue temporaries.
    vmem_need = (2 * tm * E_pad * x.dtype.itemsize
                 + 2 * tm * P * out_itemsize
                 + 2 * E_pad * P * w1.dtype.itemsize
                 + 2 * P * P * w2.dtype.itemsize
                 + 4 * P * 4
                 + 4 * tm * P * 4)
    vmem_limit = int(min(100 * 1024 * 1024, max(32 * 1024 * 1024, 2 * vmem_need)))

    kernel = functools.partial(projection_head_kernel, eps=eps)

    def build(single_buffer_weights):
        def resident(shape):
            if single_buffer_weights:
                # Grid-invariant operands: one buffer is enough (saves VMEM,
                # important for large heads on v7x's 64 MiB VMEM).
                return pl.BlockSpec(shape, lambda i: (0, 0),
                                    pipeline_mode=pl.Buffered(1))
            return pl.BlockSpec(shape, lambda i: (0, 0))

        return pl.pallas_call(
            kernel,
            out_shape=jax.ShapeDtypeStruct((B_pad, P), out_dtype),
            grid_spec=pltpu.PrefetchScalarGridSpec(
                num_scalar_prefetch=0,
                grid=(grid_m,),
                in_specs=[
                    pl.BlockSpec((tm, E_pad), lambda i: (i, 0)),  # x tile
                    resident((E_pad, P)),                         # W1 (resident)
                    resident((P, P)),                             # W2 (resident)
                    resident((4, P)),                             # b1/b2/gamma/beta
                ],
                out_specs=pl.BlockSpec((tm, P), lambda i: (i, 0)),
            ),
            compiler_params=pltpu.CompilerParams(
                dimension_semantics=("parallel",),
                vmem_limit_bytes=vmem_limit),
            cost_estimate=cost,
        )

    try:
        out = build(True)(x, w1, w2, params)
    except Exception:
        # Fallback if this jax/Mosaic build rejects pipeline_mode=pl.Buffered(1)
        # on grid-invariant operands; default double-buffered specs instead.
        out = build(False)(x, w1, w2, params)

    return out[:B] if B_pad != B else out


def _reference(x, w1, b1, w2, b2, gamma, beta, eps=1e-5):
    xf = x.astype(jnp.float32)
    projected = xf @ w1 + b1
    h = 0.5 * projected * (1.0 + jax.lax.erf(projected / jnp.sqrt(2.0)))
    h = h @ w2 + b2
    y = h + projected
    mean = jnp.mean(y, axis=-1, keepdims=True)
    var = jnp.mean((y - mean) ** 2, axis=-1, keepdims=True)
    return (y - mean) * jax.lax.rsqrt(var + eps) * gamma + beta


if __name__ == "__main__":
    # Small shapes consistent with the module: embedding_dim=32,
    # projection_dim=128 (default). B=50 also exercises ragged-batch padding.
    B, E, P = 50, 32, 128
    key = jax.random.PRNGKey(0)
    kx, kw1, kb1, kw2, kb2 = jax.random.split(key, 5)

    x = jax.random.normal(kx, (B, E), dtype=jnp.float32)

    # Deterministic synthetic parameters (already in [in, out] layout; the
    # PyTorch module stores [out, in] and would be pre-transposed).
    w1 = jax.random.normal(kw1, (E, P), dtype=jnp.float32) * (1.0 / jnp.sqrt(1.0 * E))
    b1 = jax.random.normal(kb1, (P,), dtype=jnp.float32) * 0.01
    w2 = jax.random.normal(kw2, (P, P), dtype=jnp.float32) * (1.0 / jnp.sqrt(1.0 * P))
    b2 = jax.random.normal(kb2, (P,), dtype=jnp.float32) * 0.01
    gamma = jnp.ones((P,), dtype=jnp.float32)
    beta = jnp.zeros((P,), dtype=jnp.float32)

    ref = _reference(x, w1, b1, w2, b2, gamma, beta)

    # Default (large-tile) path: tm clamps to the padded batch.
    out = jax.block_until_ready(projection_head(x, w1, b1, w2, b2, gamma, beta))
    assert out.shape == (B, P)
    assert jnp.allclose(out, ref, atol=1e-4, rtol=1e-4), "mismatch vs reference (f32)"

    # Multi-step grid + ragged-batch padding path.
    out_small = jax.block_until_ready(
        projection_head(x, w1, b1, w2, b2, gamma, beta, tm=16))
    assert jnp.allclose(out_small, ref, atol=1e-4, rtol=1e-4), "mismatch (tm=16)"

    # bf16 activations/weights: native-dtype MXU path with f32 accumulation.
    xb, w1b, w2b = (a.astype(jnp.bfloat16) for a in (x, w1, w2))
    out_bf16 = jax.block_until_ready(
        projection_head(xb, w1b, b1, w2b, b2, gamma, beta))
    ref_bf16 = _reference(xb.astype(jnp.float32), w1b.astype(jnp.float32), b1,
                          w2b.astype(jnp.float32), b2, gamma, beta)
    assert out_bf16.dtype == jnp.bfloat16
    assert jnp.allclose(out_bf16.astype(jnp.float32), ref_bf16,
                        atol=1e-1, rtol=1e-1), "mismatch (bf16)"

    # TODO(synk): Dropout is only implemented for p=0.0 (module default); a
    # p>0 training path would need pltpu.prng_seed/prng_random_bits masking.
    print("KERNEL_OK")
</pallas_src>

<mosaic_0001>
module attributes {stable_mosaic.version = 11 : i64} {
  func.func @projection_head_kernel(%arg0: i32, %arg1: memref<56x128xf32, #tpu.memory_space<vmem>>, %arg2: memref<128x128xf32, #tpu.memory_space<vmem>>, %arg3: memref<128x128xf32, #tpu.memory_space<vmem>>, %arg4: memref<4x128xf32, #tpu.memory_space<vmem>>, %arg5: memref<56x128xf32, #tpu.memory_space<vmem>>) attributes {dimension_semantics = [#tpu.dimension_semantics<parallel>], iteration_bounds = array<i64: 1>, scalar_prefetch = 0 : i64, scratch_operands = 0 : i64, tpu.core_type = #tpu.core_type<tc>, window_params = [{transform_indices = @transform_0, window_bounds = array<i64: 56, 128>}, {pipeline_mode = #tpu.pipeline_mode<synchronous>, transform_indices = @transform_1, window_bounds = array<i64: 128, 128>}, {pipeline_mode = #tpu.pipeline_mode<synchronous>, transform_indices = @transform_2, window_bounds = array<i64: 128, 128>}, {pipeline_mode = #tpu.pipeline_mode<synchronous>, transform_indices = @transform_3, window_bounds = array<i64: 4, 128>}, {transform_indices = @transform_4, window_bounds = array<i64: 56, 128>}]} {
    %c0 = arith.constant 0 : index
    %c0_0 = arith.constant 0 : index
    %0 = vector.load %arg4[%c0, %c0_0] : memref<4x128xf32, #tpu.memory_space<vmem>>, vector<4x128xf32>
    %1 = vector.extract_strided_slice %0 {offsets = [0, 0], sizes = [1, 128], strides = [1, 1]} : vector<4x128xf32> to vector<1x128xf32>
    %2 = vector.extract_strided_slice %0 {offsets = [1, 0], sizes = [1, 128], strides = [1, 1]} : vector<4x128xf32> to vector<1x128xf32>
    %3 = vector.extract_strided_slice %0 {offsets = [2, 0], sizes = [1, 128], strides = [1, 1]} : vector<4x128xf32> to vector<1x128xf32>
    %4 = vector.extract_strided_slice %0 {offsets = [3, 0], sizes = [1, 128], strides = [1, 1]} : vector<4x128xf32> to vector<1x128xf32>
    %c0_1 = arith.constant 0 : index
    %c0_2 = arith.constant 0 : index
    %5 = vector.load %arg1[%c0_1, %c0_2] : memref<56x128xf32, #tpu.memory_space<vmem>>, vector<56x128xf32>
    %c0_3 = arith.constant 0 : index
    %c0_4 = arith.constant 0 : index
    %6 = vector.load %arg2[%c0_3, %c0_4] : memref<128x128xf32, #tpu.memory_space<vmem>>, vector<128x128xf32>
    %cst = arith.constant dense<0.000000e+00> : vector<56x128xf32>
    %7 = tpu.matmul %5, %6, %cst {dimension_numbers = #tpu.dot_dimension_numbers<[1], [0], [0], [1], [0, 0, 1, 1], [], []>} : vector<56x128xf32>, vector<128x128xf32>, vector<56x128xf32> -> vector<56x128xf32>
    %8 = vector.broadcast %1 : vector<1x128xf32> to vector<56x128xf32>
    %9 = arith.addf %7, %8 : vector<56x128xf32>
    %cst_5 = arith.constant 5.000000e-01 : f32
    %10 = vector.broadcast %cst_5 : f32 to vector<56x128xf32>
    %11 = arith.mulf %10, %9 : vector<56x128xf32>
    %cst_6 = arith.constant 2.000000e+00 : f32
    %12 = math.sqrt %cst_6 : f32
    %cst_7 = arith.constant 1.000000e+00 : f32
    %13 = arith.divf %cst_7, %12 : f32
    %14 = vector.broadcast %13 : f32 to vector<56x128xf32>
    %15 = arith.mulf %9, %14 : vector<56x128xf32>
    %16 = math.erf %15 : vector<56x128xf32>
    %cst_8 = arith.constant 1.000000e+00 : f32
    %17 = vector.broadcast %cst_8 : f32 to vector<56x128xf32>
    %18 = arith.addf %17, %16 : vector<56x128xf32>
    %19 = arith.mulf %11, %18 : vector<56x128xf32>
    %c0_9 = arith.constant 0 : index
    %c0_10 = arith.constant 0 : index
    %20 = vector.load %arg3[%c0_9, %c0_10] : memref<128x128xf32, #tpu.memory_space<vmem>>, vector<128x128xf32>
    %cst_11 = arith.constant dense<0.000000e+00> : vector<56x128xf32>
    %21 = tpu.matmul %19, %20, %cst_11 {dimension_numbers = #tpu.dot_dimension_numbers<[1], [0], [0], [1], [0, 0, 1, 1], [], []>} : vector<56x128xf32>, vector<128x128xf32>, vector<56x128xf32> -> vector<56x128xf32>
    %22 = vector.broadcast %2 : vector<1x128xf32> to vector<56x128xf32>
    %23 = arith.addf %21, %22 : vector<56x128xf32>
    %24 = arith.addf %23, %9 : vector<56x128xf32>
    %cst_12 = arith.constant dense<0.000000e+00> : vector<56xf32>
    %25 = vector.multi_reduction <add>, %24, %cst_12 [1] : vector<56x128xf32> to vector<56xf32>
    %26 = vector.shape_cast %25 : vector<56xf32> to vector<56x1xf32>
    %cst_13 = arith.constant 1.280000e+02 : f32
    %27 = vector.broadcast %cst_13 : f32 to vector<56x1xf32>
    %28 = arith.divf %26, %27 : vector<56x1xf32>
    %29 = vector.broadcast %28 : vector<56x1xf32> to vector<56x128xf32>
    %30 = arith.subf %24, %29 : vector<56x128xf32>
    %31 = arith.mulf %30, %30 : vector<56x128xf32>
    %cst_14 = arith.constant dense<0.000000e+00> : vector<56xf32>
    %32 = vector.multi_reduction <add>, %31, %cst_14 [1] : vector<56x128xf32> to vector<56xf32>
    %33 = vector.shape_cast %32 : vector<56xf32> to vector<56x1xf32>
    %cst_15 = arith.constant 1.280000e+02 : f32
    %34 = vector.broadcast %cst_15 : f32 to vector<56x1xf32>
    %35 = arith.divf %33, %34 : vector<56x1xf32>
    %cst_16 = arith.constant 9.99999974E-6 : f32
    %36 = vector.broadcast %cst_16 : f32 to vector<56x1xf32>
    %37 = arith.addf %35, %36 : vector<56x1xf32>
    %38 = math.rsqrt %37 : vector<56x1xf32>
    %39 = vector.broadcast %38 : vector<56x1xf32> to vector<56x128xf32>
    %40 = arith.mulf %30, %39 : vector<56x128xf32>
    %41 = vector.broadcast %3 : vector<1x128xf32> to vector<56x128xf32>
    %42 = arith.mulf %40, %41 : vector<56x128xf32>
    %43 = vector.broadcast %4 : vector<1x128xf32> to vector<56x128xf32>
    %44 = arith.addf %42, %43 : vector<56x128xf32>
    %c0_17 = arith.constant 0 : index
    %c0_18 = arith.constant 0 : index
    %45 = vector.load %arg5[%c0_17, %c0_18] : memref<56x128xf32, #tpu.memory_space<vmem>>, vector<56x128xf32>
    tpu.vector_store %arg5[%c0_17, %c0_18], %44 {strides = array<i32>} : memref<56x128xf32, #tpu.memory_space<vmem>>, vector<56x128xf32>,
    return
  }
  func.func @transform_0(%arg0: i32) -> (i32, i32) {
    %c0_i32 = arith.constant 0 : i32
    %c0_i32_0 = arith.constant 0 : i32
    return %arg0, %c0_i32 : i32, i32
  }
  func.func @transform_1(%arg0: i32) -> (i32, i32) {
    %c0_i32 = arith.constant 0 : i32
    %c0_i32_0 = arith.constant 0 : i32
    %c0_i32_1 = arith.constant 0 : i32
    return %c0_i32, %c0_i32_0 : i32, i32
  }
  func.func @transform_2(%arg0: i32) -> (i32, i32) {
    %c0_i32 = arith.constant 0 : i32
    %c0_i32_0 = arith.constant 0 : i32
    %c0_i32_1 = arith.constant 0 : i32
    return %c0_i32, %c0_i32_0 : i32, i32
  }
  func.func @transform_3(%arg0: i32) -> (i32, i32) {
    %c0_i32 = arith.constant 0 : i32
    %c0_i32_0 = arith.constant 0 : i32
    %c0_i32_1 = arith.constant 0 : i32
    return %c0_i32, %c0_i32_0 : i32, i32
  }
  func.func @transform_4(%arg0: i32) -> (i32, i32) {
    %c0_i32 = arith.constant 0 : i32
    %c0_i32_0 = arith.constant 0 : i32
    return %arg0, %c0_i32 : i32, i32
  }
}

module attributes {stable_mosaic.version = 11 : i64} {
  func.func @projection_head_kernel(%arg0: i32, %arg1: memref<56x128xf32, #tpu.memory_space<vmem>>, %arg2: memref<128x128xf32, #tpu.memory_space<vmem>>, %arg3: memref<128x128xf32, #tpu.memory_space<vmem>>, %arg4: memref<4x128xf32, #tpu.memory_space<vmem>>, %arg5: memref<56x128xf32, #tpu.memory_space<vmem>>) attributes {dimension_semantics = [#tpu.dimension_semantics<parallel>], iteration_bounds = array<i64: 1>, scalar_prefetch = 0 : i64, scratch_operands = 0 : i64, tpu.core_type = #tpu.core_type<tc>, window_params = [{transform_indices = @transform_0, window_bounds = array<i64: 56, 128>}, {pipeline_mode = #tpu.pipeline_mode<synchronous>, transform_indices = @transform_1, window_bounds = array<i64: 128, 128>}, {pipeline_mode = #tpu.pipeline_mode<synchronous>, transform_indices = @transform_2, window_bounds = array<i64: 128, 128>}, {pipeline_mode = #tpu.pipeline_mode<synchronous>, transform_indices = @transform_3, window_bounds = array<i64: 4, 128>}, {transform_indices = @transform_4, window_bounds = array<i64: 56, 128>}]} {
    %c0 = arith.constant 0 : index
    %c0_0 = arith.constant 0 : index
    %0 = vector.load %arg4[%c0, %c0_0] : memref<4x128xf32, #tpu.memory_space<vmem>>, vector<4x128xf32>
    %1 = vector.extract_strided_slice %0 {offsets = [0, 0], sizes = [1, 128], strides = [1, 1]} : vector<4x128xf32> to vector<1x128xf32>
    %2 = vector.extract_strided_slice %0 {offsets = [1, 0], sizes = [1, 128], strides = [1, 1]} : vector<4x128xf32> to vector<1x128xf32>
    %3 = vector.extract_strided_slice %0 {offsets = [2, 0], sizes = [1, 128], strides = [1, 1]} : vector<4x128xf32> to vector<1x128xf32>
    %4 = vector.extract_strided_slice %0 {offsets = [3, 0], sizes = [1, 128], strides = [1, 1]} : vector<4x128xf32> to vector<1x128xf32>
    %c0_1 = arith.constant 0 : index
    %c0_2 = arith.constant 0 : index
    %5 = vector.load %arg1[%c0_1, %c0_2] : memref<56x128xf32, #tpu.memory_space<vmem>>, vector<56x128xf32>
    %c0_3 = arith.constant 0 : index
    %c0_4 = arith.constant 0 : index
    %6 = vector.load %arg2[%c0_3, %c0_4] : memref<128x128xf32, #tpu.memory_space<vmem>>, vector<128x128xf32>
    %cst = arith.constant dense<0.000000e+00> : vector<56x128xf32>
    %7 = tpu.matmul %5, %6, %cst {dimension_numbers = #tpu.dot_dimension_numbers<[1], [0], [0], [1], [0, 0, 1, 1], [], []>} : vector<56x128xf32>, vector<128x128xf32>, vector<56x128xf32> -> vector<56x128xf32>
    %8 = vector.broadcast %1 : vector<1x128xf32> to vector<56x128xf32>
    %9 = arith.addf %7, %8 : vector<56x128xf32>
    %cst_5 = arith.constant 5.000000e-01 : f32
    %10 = vector.broadcast %cst_5 : f32 to vector<56x128xf32>
    %11 = arith.mulf %10, %9 : vector<56x128xf32>
    %cst_6 = arith.constant 2.000000e+00 : f32
    %12 = math.sqrt %cst_6 : f32
    %cst_7 = arith.constant 1.000000e+00 : f32
    %13 = arith.divf %cst_7, %12 : f32
    %14 = vector.broadcast %13 : f32 to vector<56x128xf32>
    %15 = arith.mulf %9, %14 : vector<56x128xf32>
    %16 = math.erf %15 : vector<56x128xf32>
    %cst_8 = arith.constant 1.000000e+00 : f32
    %17 = vector.broadcast %cst_8 : f32 to vector<56x128xf32>
    %18 = arith.addf %17, %16 : vector<56x128xf32>
    %19 = arith.mulf %11, %18 : vector<56x128xf32>
    %c0_9 = arith.constant 0 : index
    %c0_10 = arith.constant 0 : index
    %20 = vector.load %arg3[%c0_9, %c0_10] : memref<128x128xf32, #tpu.memory_space<vmem>>, vector<128x128xf32>
    %cst_11 = arith.constant dense<0.000000e+00> : vector<56x128xf32>
    %21 = tpu.matmul %19, %20, %cst_11 {dimension_numbers = #tpu.dot_dimension_numbers<[1], [0], [0], [1], [0, 0, 1, 1], [], []>} : vector<56x128xf32>, vector<128x128xf32>, vector<56x128xf32> -> vector<56x128xf32>
    %22 = vector.broadcast %2 : vector<1x128xf32> to vector<56x128xf32>
    %23 = arith.addf %21, %22 : vector<56x128xf32>
    %24 = arith.addf %23, %9 : vector<56x128xf32>
    %cst_12 = arith.constant dense<0.000000e+00> : vector<56xf32>
    %25 = vector.multi_reduction <add>, %24, %cst_12 [1] : vector<56x128xf32> to vector<56xf32>
    %26 = vector.shape_cast %25 : vector<56xf32> to vector<56x1xf32>
    %cst_13 = arith.constant 1.280000e+02 : f32
    %27 = vector.broadcast %cst_13 : f32 to vector<56x1xf32>
    %28 = arith.divf %26, %27 : vector<56x1xf32>
    %29 = vector.broadcast %28 : vector<56x1xf32> to vector<56x128xf32>
    %30 = arith.subf %24, %29 : vector<56x128xf32>
    %31 = arith.mulf %30, %30 : vector<56x128xf32>
    %cst_14 = arith.constant dense<0.000000e+00> : vector<56xf32>
    %32 = vector.multi_reduction <add>, %31, %cst_14 [1] : vector<56x128xf32> to vector<56xf32>
    %33 = vector.shape_cast %32 : vector<56xf32> to vector<56x1xf32>
    %cst_15 = arith.constant 1.280000e+02 : f32
    %34 = vector.broadcast %cst_15 : f32 to vector<56x1xf32>
    %35 = arith.divf %33, %34 : vector<56x1xf32>
    %cst_16 = arith.constant 9.99999974E-6 : f32
    %36 = vector.broadcast %cst_16 : f32 to vector<56x1xf32>
    %37 = arith.addf %35, %36 : vector<56x1xf32>
    %38 = math.rsqrt %37 : vector<56x1xf32>
    %39 = vector.broadcast %38 : vector<56x1xf32> to vector<56x128xf32>
    %40 = arith.mulf %30, %39 : vector<56x128xf32>
    %41 = vector.broadcast %3 : vector<1x128xf32> to vector<56x128xf32>
    %42 = arith.mulf %40, %41 : vector<56x128xf32>
    %43 = vector.broadcast %4 : vector<1x128xf32> to vector<56x128xf32>
    %44 = arith.addf %42, %43 : vector<56x128xf32>
    %c0_17 = arith.constant 0 : index
    %c0_18 = arith.constant 0 : index
    %45 = vector.load %arg5[%c0_17, %c0_18] : memref<56x128xf32, #tpu.memory_space<vmem>>, vector<56x128xf32>
    tpu.vector_store %arg5[%c0_17, %c0_18], %44 {strides = array<i32>} : memref<56x128xf32, #tpu.memory_space<vmem>>, vector<56x128xf32>,
    return
  }
  func.func @transform_0(%arg0: i32) -> (i32, i32) {
    %c0_i32 = arith.constant 0 : i32
    %c0_i32_0 = arith.constant 0 : i32
    return %arg0, %c0_i32 : i32, i32
  }
  func.func @transform_1(%arg0: i32) -> (i32, i32) {
    %c0_i32 = arith.constant 0 : i32
    %c0_i32_0 = arith.constant 0 : i32
    %c0_i32_1 = arith.constant 0 : i32
    return %c0_i32, %c0_i32_0 : i32, i32
  }
  func.func @transform_2(%arg0: i32) -> (i32, i32) {
    %c0_i32 = arith.constant 0 : i32
    %c0_i32_0 = arith.constant 0 : i32
    %c0_i32_1 = arith.constant 0 : i32
    return %c0_i32, %c0_i32_0 : i32, i32
  }
  func.func @transform_3(%arg0: i32) -> (i32, i32) {
    %c0_i32 = arith.constant 0 : i32
    %c0_i32_0 = arith.constant 0 : i32
    %c0_i32_1 = arith.constant 0 : i32
    return %c0_i32, %c0_i32_0 : i32, i32
  }
  func.func @transform_4(%arg0: i32) -> (i32, i32) {
    %c0_i32 = arith.constant 0 : i32
    %c0_i32_0 = arith.constant 0 : i32
    return %arg0, %c0_i32 : i32, i32
  }
}

</mosaic_0001>

<bundles_post_ra>
// kernel: tpu_custom_call.1
= control target key start
LH: loop header
LB: loop body
LE: loop exit
PB: predicated region body
PF: predicated region fallthrough
CT: control target
= control target key end

     0   :  { %9 = vsyncpa [#allocation3], 0  ;;  %s1020_s0 = inlined_call_operand.hbm [shape: f32[56,128], index: 0, kind: input, shape index: {}]   ;;  %s1021_s1 = inlined_call_operand.hbm [shape: f32[128,128], index: 1, kind: input, shape index: {}]   ;;  %s1022_s2 = inlined_call_operand.hbm [shape: f32[128,128], index: 2, kind: input, shape index: {}]   ;;  %s1023_s3 = inlined_call_operand.vmem [shape: f32[4,128], index: 3, kind: input, shape index: {}]   ;;  %s1024_s4 = inlined_call_operand.hbm [shape: f32[56,128], index: 4, kind: output, shape index: {}]  }
   0x1   :  { %10 = vsyncpa [#allocation6], 0 }
   0x2   :  { %11 = vsyncpa [#allocation4], 0  ;;  %s805_s15 = smov [#allocation5]   ;;  %s806_s17 = smov [#allocation2]  }
   0x3   :  { %s29_s16 = sshll.u32 %s805_s15, 4  ;;  %s17_s18 = sshll.u32 %s806_s17, 4  ;;  %s30_s16 = int_to_ptr.vmem [resolvable:$true] %s29_s16  ;;  %s839_s18 = int_to_ptr.vmem [resolvable:$true] %s17_s18 }
   0x4   :  { %s711_s21 = scalar_lea.hbm %s1021_s1, 2048 }
   0x5   :  { %p712_p0 = scmp.ne.s32.totalorder %s1021_s1, %s711_s21  ;;  %p715_p1 = scmp.lt.u32.totalorder %s711_s21, %s1021_s1 }
   0x7   :  { %p717_p2 = pnand %p715_p1, %p712_p0 }
   0x9   :  { %720 = shalt.err (!%p717_p2)
}
   0xa   :  { %s721_s26 = scalar_lea.vmem %s30_s16, 2048  ;;  %p726_p4 = scmp.lt.s32.totalorder %s30_s16, %s30_s16 }
   0xb   :  { %p722_p3 = scmp.ne.s32.totalorder %s30_s16, %s721_s26  ;;  %p727_p5 = scmp.lt.s32.totalorder %s721_s26, %s721_s26 }
   0xd   :  { %p728_p6 = por %p727_p5, %p726_p4 }
   0xf   :  { %p729_p7 = pnand %p728_p6, %p722_p3 }
  0x11   :  { %732 = shalt.err (!%p729_p7)
}
  0x12   :  { %s807_s27 = smov 128   ;;  %s808_s28 = smov 8  }
  0x13   :  { %35 = dma.hbm_to_vmem [thread:$0]  %s1021_s1, 2048, %s30_s16, [#allocation6], %s807_s27, %s807_s27, %s808_s28  }
  0x14   :  { %s733_s7 = scalar_lea.hbm %s1020_s0, 896 }
  0x15   :  { %p734_p8 = scmp.ne.s32.totalorder %s1020_s0, %s733_s7  ;;  %p737_p9 = scmp.lt.u32.totalorder %s733_s7, %s1020_s0 }
  0x17   :  { %p739_p10 = pnand %p737_p9, %p734_p8 }
  0x19   :  { %742 = shalt.err (!%p739_p10)
}
  0x1a   :  { %s743_s12 = scalar_lea.vmem %s839_s18, 896  ;;  %p748_p12 = scmp.lt.s32.totalorder %s839_s18, %s839_s18 }
  0x1b   :  { %p744_p11 = scmp.ne.s32.totalorder %s839_s18, %s743_s12  ;;  %p749_p13 = scmp.lt.s32.totalorder %s743_s12, %s743_s12 }
  0x1d   :  { %p750_p0 = por %p749_p13, %p748_p12 }
  0x1f   :  { %p751_p1 = pnand %p750_p0, %p744_p11 }
  0x21   :  { %754 = shalt.err (!%p751_p1)
}
  0x22   :  { %23 = dma.hbm_to_vmem [thread:$0]  %s1020_s0, 896, %s839_s18, [#allocation3], %s807_s27, %s807_s27, %s808_s28  }
  0x23   :  { %s809_s14 = smov [#allocation7]   ;;  %s755_s19 = scalar_lea.hbm %s1022_s2, 2048 }
  0x24   :  { %s41_s15 = sshll.u32 %s809_s14, 4  ;;  %p756_p2 = scmp.ne.s32.totalorder %s1022_s2, %s755_s19  ;;  %s42_s15 = int_to_ptr.vmem [resolvable:$true] %s41_s15 }
  0x25   :  { %p759_p3 = scmp.lt.u32.totalorder %s755_s19, %s1022_s2 }
  0x27   :  { %p761_p4 = pnand %p759_p3, %p756_p2 }
  0x29   :  { %764 = shalt.err (!%p761_p4)
}
  0x2a   :  { %s765_s24 = scalar_lea.vmem %s42_s15, 2048  ;;  %p770_p6 = scmp.lt.s32.totalorder %s42_s15, %s42_s15 }
  0x2b   :  { %p766_p5 = scmp.ne.s32.totalorder %s42_s15, %s765_s24  ;;  %p771_p7 = scmp.lt.s32.totalorder %s765_s24, %s765_s24 }
  0x2d   :  { %p772_p8 = por %p771_p7, %p770_p6 }
  0x2f   :  { %p773_p9 = pnand %p772_p8, %p766_p5 }
  0x31   :  { %776 = shalt.err (!%p773_p9)
}
  0x32   :  { %47 = dma.hbm_to_vmem [thread:$0]  %s1022_s2, 2048, %s42_s15, [#allocation6], %s807_s27, %s807_s27, %s808_s28  }
  0x33   :  { %799 = dma.done.wait [#allocation3], 896  }
  0x34   :  { %800 = vsyncadd [#allocation3], 4294966400 }
  0x35   :  { %801 = dma.done.wait [#allocation6], 4096  }
  0x36   :  { %802 = vsyncadd [#allocation6], 4294963200  ;;  %v810_v0 = vmov 0.0|0.0   ;;  %vm811_vm0 = vmmov 0   ;;  %v812_v1 = vmov 0.0   ;;  %v67_v2 = vld [vmem:[#allocation5] sm:$0xff]  ;;  %v83_v57 = vlaneseq }
  0x37   :  { %626 = vmatprep.subr.bf16.mxu0 %v810_v0  ;;  %552 = vmatprep.mubr.msk.f32.mxu0 %vm811_vm0, %v812_v1  ;;  %v68_v3 = vld [vmem:[#allocation5 + $0x8] sm:$0xff]  ;;  %v69_v4 = vld [vmem:[#allocation5 + $0x10] sm:$0xff]  ;;  %v70_v6 = vld [vmem:[#allocation5 + $0x18] sm:$0xff] }
  0x38   :  { %650 = vmatprep.subr.bf16.mxu1 %v810_v0  ;;  %605 = vmatprep.mubr.msk.f32.mxu1 %vm811_vm0, %v812_v1  ;;  %v627_v5 = vpack.c.bf16 %v68_v3, %v67_v2  ;;  %v630_v7 = vpack.c.bf16 %v70_v6, %v69_v4  ;;  %v71_v8 = vld [vmem:[#allocation5 + $0x20] sm:$0xff]  ;;  %v72_v9 = vld [vmem:[#allocation5 + $0x28] sm:$0xff]  ;;  %v73_v11 = vld [vmem:[#allocation5 + $0x30] sm:$0xff]  ;;  %v923_v58 = vshrl.u32 %v83_v57, 7 }
  0x39   :  { %v633_v10 = vpack.c.bf16 %v72_v9, %v71_v8  ;;  %v74_v12 = vld [vmem:[#allocation5 + $0x38] sm:$0xff]  ;;  %v222_v13 = vld [vmem:[#allocation7] sm:$0xff]  ;;  %v223_v14 = vld [vmem:[#allocation7 + $0x8] sm:$0xff] }
  0x3a   :  { %628 = vmatpush3.bf16.msra.mxu0 %v627_v5  ;;  %v224_v15 = vld [vmem:[#allocation7 + $0x10] sm:$0xff]  ;;  %v225_v16 = vld [vmem:[#allocation7 + $0x18] sm:$0xff]  ;;  %v651_v17 = vpack.c.bf16 %v223_v14, %v222_v13  ;;  %v636_v18 = vpack.c.bf16 %v74_v12, %v73_v11  ;;  %v75_v19 = vld [vmem:[#allocation5 + $0x40] sm:$0xff]  ;;  %v85_v59 = vsub.s32 0, %v923_v58 }
  0x3b   :  { %629 = vmatprep.subr.bf16.mxu0 %v810_v0  ;;  %v654_v20 = vpack.c.bf16 %v225_v16, %v224_v15  ;;  %v76_v21 = vld [vmem:[#allocation5 + $0x48] sm:$0xff]  ;;  %v226_v22 = vld [vmem:[#allocation7 + $0x20] sm:$0xff]  ;;  %v77_v26 = vld [vmem:[#allocation5 + $0x50] sm:$0xff] }
  0x3c   :  { %652 = vmatpush3.bf16.msra.mxu1 %v651_v17  ;;  %v227_v23 = vld [vmem:[#allocation7 + $0x28] sm:$0xff]  ;;  %v639_v24 = vpack.c.bf16 %v76_v21, %v75_v19  ;;  %v78_v27 = vld [vmem:[#allocation5 + $0x58] sm:$0xff]  ;;  %v79_v29 = vld [vmem:[#allocation5 + $0x60] sm:$0xff] }
  0x3d   :  { %653 = vmatprep.subr.bf16.mxu1 %v810_v0  ;;  %v657_v25 = vpack.c.bf16 %v227_v23, %v226_v22  ;;  %v642_v28 = vpack.c.bf16 %v78_v27, %v77_v26  ;;  %v80_v30 = vld [vmem:[#allocation5 + $0x68] sm:$0xff]  ;;  %v81_v32 = vld [vmem:[#allocation5 + $0x70] sm:$0xff]  ;;  %v82_v33 = vld [vmem:[#allocation5 + $0x78] sm:$0xff] }
  0x3e   :  { %631 = vmatpush3.bf16.msra.mxu0 %v630_v7  ;;  %v645_v31 = vpack.c.bf16 %v80_v30, %v79_v29  ;;  %v648_v34 = vpack.c.bf16 %v82_v33, %v81_v32  ;;  %v60_v35 = vld [vmem:[#allocation2] sm:$0xff]  ;;  %v61_v36 = vld [vmem:[#allocation2 + $0x8] sm:$0xff]  ;;  %v62_v37 = vld [vmem:[#allocation2 + $0x10] sm:$0xff] }
  0x3f   :  { %632 = vmatprep.subr.bf16.mxu0 %v810_v0  ;;  %v63_v38 = vld [vmem:[#allocation2 + $0x18] sm:$0xff]  ;;  %v64_v39 = vld [vmem:[#allocation2 + $0x20] sm:$0xff]  ;;  %v65_v40 = vld [vmem:[#allocation2 + $0x28] sm:$0xff] }
  0x40   :  { %655 = vmatpush3.bf16.msra.mxu1 %v654_v20  ;;  %v66_v41 = vld [vmem:[#allocation2 + $0x30] sm:$0xff]  ;;  %v228_v42 = vld [vmem:[#allocation7 + $0x30] sm:$0xff]  ;;  %v230_v45 = vld [vmem:[#allocation7 + $0x40] sm:$0xff] }
  0x41   :  { %656 = vmatprep.subr.bf16.mxu1 %v810_v0  ;;  %v229_v43 = vld [vmem:[#allocation7 + $0x38] sm:$0xff]  ;;  %v231_v46 = vld [vmem:[#allocation7 + $0x48] sm:$0xff]  ;;  %v232_v48 = vld [vmem:[#allocation7 + $0x50] sm:$0xff] }
  0x42   :  { %634 = vmatpush3.bf16.msra.mxu0 %v633_v10  ;;  %v660_v44 = vpack.c.bf16 %v229_v43, %v228_v42  ;;  %v663_v47 = vpack.c.bf16 %v231_v46, %v230_v45  ;;  %v233_v49 = vld [vmem:[#allocation7 + $0x58] sm:$0xff]  ;;  %v234_v51 = vld [vmem:[#allocation7 + $0x60] sm:$0xff]  ;;  %v235_v52 = vld [vmem:[#allocation7 + $0x68] sm:$0xff] }
  0x43   :  { %635 = vmatprep.subr.bf16.mxu0 %v810_v0  ;;  %v666_v50 = vpack.c.bf16 %v233_v49, %v232_v48  ;;  %v669_v53 = vpack.c.bf16 %v235_v52, %v234_v51  ;;  %v236_v54 = vld [vmem:[#allocation7 + $0x70] sm:$0xff]  ;;  %v237_v55 = vld [vmem:[#allocation7 + $0x78] sm:$0xff]  ;;  %v929_v60 = vld [vmem:[%s1023_s3] sm:$0xf]  ;;  %s813_s3 = smov [#allocation8]  }
  0x44   :  { %658 = vmatpush3.bf16.msra.mxu1 %v657_v25  ;;  %v672_v56 = vpack.c.bf16 %v237_v55, %v236_v54  ;;  %v86_v61 = vrot.slane %v929_v60, %v85_v59  ;;  %v240_v55 = vsub.s32 1, %v923_v58  ;;  %s461_s26 = sshll.u32 %s813_s3, 4  ;;  %s462_s26 = int_to_ptr.vmem [resolvable:$true] %s461_s26 }
  0x45   :  { %659 = vmatprep.subr.bf16.mxu1 %v810_v0  ;;  %s777_s29 = scalar_lea.vmem %s462_s26, 896  ;;  %p782_p11 = scmp.lt.s32.totalorder %s462_s26, %s462_s26 }
  0x46   :  { %637 = vmatpush3.bf16.msra.mxu0 %v636_v18  ;;  %p778_p10 = scmp.ne.s32.totalorder %s462_s26, %s777_s29  ;;  %p783_p12 = scmp.lt.s32.totalorder %s777_s29, %s777_s29 }
  0x47   :  { %638 = vmatprep.subr.bf16.mxu0 %v810_v0 }
  0x48   :  { %661 = vmatpush3.bf16.msra.mxu1 %v660_v44  ;;  %p784_p13 = por %p783_p12, %p782_p11 }
  0x49   :  { %662 = vmatprep.subr.bf16.mxu1 %v810_v0 }
  0x4a   :  { %640 = vmatpush3.bf16.msra.mxu0 %v639_v24  ;;  %p785_p0 = pnand %p784_p13, %p778_p10 }
  0x4b   :  { %641 = vmatprep.subr.bf16.mxu0 %v810_v0 }
  0x4c   :  { %664 = vmatpush3.bf16.msra.mxu1 %v663_v47 }
  0x4d   :  { %665 = vmatprep.subr.bf16.mxu1 %v810_v0 }
  0x4e   :  { %643 = vmatpush3.bf16.msra.mxu0 %v642_v28 }
  0x4f   :  { %644 = vmatprep.subr.bf16.mxu0 %v810_v0 }
  0x50   :  { %667 = vmatpush3.bf16.msra.mxu1 %v666_v50 }
  0x51   :  { %668 = vmatprep.subr.bf16.mxu1 %v810_v0 }
  0x52   :  { %646 = vmatpush3.bf16.msra.mxu0 %v645_v31 }
  0x53   :  { %647 = vmatprep.subr.bf16.mxu0 %v810_v0 }
  0x54   :  { %670 = vmatpush3.bf16.msra.mxu1 %v669_v53 }
  0x55   :  { %671 = vmatprep.subr.bf16.mxu1 %v810_v0 }
  0x56   :  { %649 = vmatpush3.bf16.msra.mxu0 %v648_v34 }
  0x58   :  { %673 = vmatpush3.bf16.msra.mxu1 %v672_v56  ;;  %v241_v56 = vrot.slane %v929_v60, %v240_v55 }
  0x59   :  { %553 = vmatmul.mubr.f32.vlgmr.msra.gmra.mrb[0].mxu0 %v60_v35 }
  0x5a   :  { %555 = vmatprep.mubr.msk.f32.mxu0 %vm811_vm0, %v812_v1 }
  0x5d   :  { %556 = vmatmul.mubr.f32.gmra.mrb[2].mxu0 %v61_v36 }
  0x5e   :  { %558 = vmatprep.mubr.msk.f32.mxu0 %vm811_vm0, %v812_v1 }
  0x61   :  { %559 = vmatmul.mubr.f32.gmra.mrb[4].mxu0 %v62_v37 }
  0x62   :  { %561 = vmatprep.mubr.msk.f32.mxu0 %vm811_vm0, %v812_v1 }
  0x65   :  { %562 = vmatmul.mubr.f32.gmra.mrb[6].mxu0 %v63_v38 }
  0x66   :  { %564 = vmatprep.mubr.msk.f32.mxu0 %vm811_vm0, %v812_v1 }
  0x69   :  { %565 = vmatmul.mubr.f32.gmra.mrb[8].mxu0 %v64_v39 }
  0x6a   :  { %567 = vmatprep.mubr.msk.f32.mxu0 %vm811_vm0, %v812_v1 }
  0x6d   :  { %568 = vmatmul.mubr.f32.gmra.mrb[10].mxu0 %v65_v40 }
  0x6e   :  { %570 = vmatprep.mubr.msk.f32.mxu0 %vm811_vm0, %v812_v1 }
  0x71   :  { %571 = vmatmul.mubr.f32.gmra.mrb[12].mxu0 %v66_v41 }
 0x12c   :  { %v153_v62 = vpop.f32.mrb[0].mxu0 }
 0x12d   :  { %v932_v63 = vadd.f32 %v153_v62, %v86_v61  ;;  %v554_v0 = vpop.f32.mrb[1].mxu0 }
 0x12f   :  { %v194_v2 = vmul.f32 0.70710677, %v932_v63  ;;  %v187_v16 = vmul.f32 0.5, %v932_v63 }
 0x130   :  { %v158_v3 = vpop.f32.mrb[2].mxu0 }
 0x131   :  { %683 = verf.f32 %v194_v2  ;;  %v935_v4 = vadd.f32 %v158_v3, %v86_v61  ;;  %v557_v5 = vpop.f32.mrb[3].mxu0 }
 0x133   :  { %v195_v6 = vmul.f32 0.70710677, %v935_v4  ;;  %v188_v24 = vmul.f32 0.5, %v935_v4 }
 0x134   :  { %v163_v7 = vpop.f32.mrb[4].mxu0 }
 0x135   :  { %685 = verf.f32 %v195_v6  ;;  %v938_v8 = vadd.f32 %v163_v7, %v86_v61  ;;  %v560_v9 = vpop.f32.mrb[5].mxu0 }
 0x137   :  { %v196_v10 = vmul.f32 0.70710677, %v938_v8  ;;  %v189_v32 = vmul.f32 0.5, %v938_v8 }
 0x138   :  { %v168_v11 = vpop.f32.mrb[6].mxu0 }
 0x139   :  { %687 = verf.f32 %v196_v10  ;;  %v941_v12 = vadd.f32 %v168_v11, %v86_v61  ;;  %v563_v13 = vpop.f32.mrb[7].mxu0 }
 0x13b   :  { %v684_v14 = vpop.eup %683  ;;  %v197_v15 = vmul.f32 0.70710677, %v941_v12  ;;  %v190_v40 = vmul.f32 0.5, %v941_v12 }
 0x13c   :  { %v173_v17 = vpop.f32.mrb[8].mxu0  ;;  %v208_v18 = vadd.f32 1.0, %v684_v14 }
 0x13d   :  { %689 = verf.f32 %v197_v15  ;;  %v945_v19 = vadd.f32 %v173_v17, %v86_v61  ;;  %v566_v20 = vpop.f32.mrb[9].mxu0 }
 0x13e   :  { %v215_v21 = vmul.f32 %v208_v18, %v187_v16 }
 0x13f   :  { %v686_v22 = vpop.eup %685  ;;  %v198_v23 = vmul.f32 0.70710677, %v945_v19  ;;  %v191_v44 = vmul.f32 0.5, %v945_v19 }
 0x140   :  { %v178_v25 = vpop.f32.mrb[10].mxu0  ;;  %606 = vmatmul.mubr.f32.vlgmr.msra.gmra.mrb[0].mxu1 %v215_v21  ;;  %v209_v26 = vadd.f32 1.0, %v686_v22 }
 0x141   :  { %691 = verf.f32 %v198_v23  ;;  %v949_v27 = vadd.f32 %v178_v25, %v86_v61  ;;  %v569_v28 = vpop.f32.mrb[11].mxu0  ;;  %608 = vmatprep.mubr.msk.f32.mxu1 %vm811_vm0, %v812_v1 }
 0x142   :  { %v216_v29 = vmul.f32 %v209_v26, %v188_v24 }
 0x143   :  { %v688_v30 = vpop.eup %687  ;;  %v199_v31 = vmul.f32 0.70710677, %v949_v27  ;;  %v192_v48 = vmul.f32 0.5, %v949_v27 }
 0x144   :  { %v183_v33 = vpop.f32.mrb[12].mxu0  ;;  %609 = vmatmul.mubr.f32.gmra.mrb[2].mxu1 %v216_v29  ;;  %v210_v34 = vadd.f32 1.0, %v688_v30 }
 0x145   :  { %693 = verf.f32 %v199_v31  ;;  %v955_v35 = vadd.f32 %v183_v33, %v86_v61  ;;  %v572_v36 = vpop.f32.mrb[13].mxu0  ;;  %611 = vmatprep.mubr.msk.f32.mxu1 %vm811_vm0, %v812_v1 }
 0x146   :  { %v217_v37 = vmul.f32 %v210_v34, %v189_v32 }
 0x147   :  { %v690_v38 = vpop.eup %689  ;;  %v200_v39 = vmul.f32 0.70710677, %v955_v35  ;;  %v193_v52 = vmul.f32 0.5, %v955_v35 }
 0x148   :  { %612 = vmatmul.mubr.f32.gmra.mrb[4].mxu1 %v217_v37  ;;  %v211_v41 = vadd.f32 1.0, %v690_v38 }
 0x149   :  { %695 = verf.f32 %v200_v39  ;;  %614 = vmatprep.mubr.msk.f32.mxu1 %vm811_vm0, %v812_v1 }
 0x14a   :  { %v218_v42 = vmul.f32 %v211_v41, %v190_v40 }
 0x14b   :  { %v692_v43 = vpop.eup %691 }
 0x14c   :  { %615 = vmatmul.mubr.f32.gmra.mrb[6].mxu1 %v218_v42  ;;  %v212_v45 = vadd.f32 1.0, %v692_v43 }
 0x14d   :  { %617 = vmatprep.mubr.msk.f32.mxu1 %vm811_vm0, %v812_v1 }
 0x14e   :  { %v219_v46 = vmul.f32 %v212_v45, %v191_v44 }
 0x14f   :  { %v694_v47 = vpop.eup %693 }
 0x150   :  { %618 = vmatmul.mubr.f32.gmra.mrb[8].mxu1 %v219_v46  ;;  %v213_v49 = vadd.f32 1.0, %v694_v47 }
 0x151   :  { %620 = vmatprep.mubr.msk.f32.mxu1 %vm811_vm0, %v812_v1 }
 0x152   :  { %v220_v50 = vmul.f32 %v213_v49, %v192_v48 }
 0x153   :  { %v696_v51 = vpop.eup %695 }
 0x154   :  { %621 = vmatmul.mubr.f32.gmra.mrb[10].mxu1 %v220_v50  ;;  %v214_v53 = vadd.f32 1.0, %v696_v51 }
 0x155   :  { %623 = vmatprep.mubr.msk.f32.mxu1 %vm811_vm0, %v812_v1 }
 0x156   :  { %v221_v54 = vmul.f32 %v214_v53, %v193_v52 }
 0x158   :  { %624 = vmatmul.mubr.f32.gmra.mrb[12].mxu1 %v221_v54 }
 0x213   :  { %v308_v57 = vpop.f32.mrb[0].mxu1 }
 0x214   :  { %v309_v59 = vadd.f32 %v308_v57, %v241_v56  ;;  %v607_v61 = vpop.f32.mrb[1].mxu1 }
 0x215   :  { %v429_v61 = vsub.s32 2, %v923_v58 }
 0x216   :  { %v342_v62 = vadd.f32 %v309_v59, %v932_v63 }
 0x217   :  { %v313_v0 = vpop.f32.mrb[2].mxu1 }
 0x218   :  { %v314_v2 = vadd.f32 %v313_v0, %v241_v56  ;;  %349 = vadd.xlane.f32.xlu0 %v342_v62  ;;  %v610_v3 = vpop.f32.mrb[3].mxu1  ;;  %v440_v0 = vsub.s32 3, %v923_v58 }
 0x21a   :  { %v343_v5 = vadd.f32 %v314_v2, %v935_v4 }
 0x21b   :  { %v318_v6 = vpop.f32.mrb[4].mxu1 }
 0x21c   :  { %v319_v7 = vadd.f32 %v318_v6, %v241_v56  ;;  %351 = vadd.xlane.f32.xlu0 %v343_v5  ;;  %v613_v1 = vpop.f32.mrb[5].mxu1 }
 0x21d   :  { %v441_v1 = vrot.slane %v929_v60, %v440_v0 }
 0x21e   :  { %v344_v9 = vadd.f32 %v319_v7, %v938_v8 }
 0x21f   :  { %v323_v10 = vpop.f32.mrb[6].mxu1 }
 0x220   :  { %v324_v11 = vadd.f32 %v323_v10, %v241_v56  ;;  %353 = vadd.xlane.f32.xlu1 %v344_v9  ;;  %v616_v13 = vpop.f32.mrb[7].mxu1 }
 0x222   :  { %v345_v14 = vadd.f32 %v324_v11, %v941_v12 }
 0x223   :  { %v328_v15 = vpop.f32.mrb[8].mxu1 }
 0x224   :  { %v329_v63 = vadd.f32 %v328_v15, %v241_v56  ;;  %355 = vadd.xlane.f32.xlu1 %v345_v14  ;;  %v619_v16 = vpop.f32.mrb[9].mxu1 }
 0x226   :  { %v346_v17 = vadd.f32 %v329_v63, %v945_v19 }
 0x227   :  { %v333_v18 = vpop.f32.mrb[10].mxu1 }
 0x228   :  { %v334_v4 = vadd.f32 %v333_v18, %v241_v56  ;;  %357 = vadd.xlane.f32.xlu0 %v346_v17  ;;  %v622_v20 = vpop.f32.mrb[11].mxu1 }
 0x22a   :  { %v347_v21 = vadd.f32 %v334_v4, %v949_v27 }
 0x22b   :  { %v338_v22 = vpop.f32.mrb[12].mxu1 }
 0x22c   :  { %v339_v8 = vadd.f32 %v338_v22, %v241_v56  ;;  %359 = vadd.xlane.f32.xlu1 %v347_v21  ;;  %v625_v23 = vpop.f32.mrb[13].mxu1 }
 0x22e   :  { %v348_v24 = vadd.f32 %v339_v8, %v955_v35 }
 0x230   :  { %361 = vadd.xlane.f32.xlu0 %v348_v24 }
 0x2a5   :  { %v350_v12 = vpop.xlane.xlu0 %349 }
 0x2a6   :  { %v364_v25 = vmul.f32 0.0078125, %v350_v12 }
 0x2a8   :  { %v371_v26 = vsub.f32 %v342_v62, %v364_v25 }
 0x2a9   :  { %v352_v28 = vpop.xlane.xlu0 %351 }
 0x2aa   :  { %v365_v29 = vmul.f32 0.0078125, %v352_v28  ;;  %v378_v30 = vmul.f32 %v371_v26, %v371_v26 }
 0x2ac   :  { %v372_v19 = vsub.f32 %v343_v5, %v365_v29  ;;  %385 = vadd.xlane.f32.xlu1 %v378_v30  ;;  %v430_v5 = vrot.slane %v929_v60, %v429_v61 }
 0x2ad   :  { %v354_v31 = vpop.xlane.xlu1 %353 }
 0x2ae   :  { %v366_v32 = vmul.f32 0.0078125, %v354_v31  ;;  %v379_v33 = vmul.f32 %v372_v19, %v372_v19 }
 0x2b0   :  { %v373_v34 = vsub.f32 %v344_v9, %v366_v32  ;;  %387 = vadd.xlane.f32.xlu0 %v379_v33 }
 0x2b1   :  { %v356_v27 = vpop.xlane.xlu1 %355 }
 0x2b2   :  { %v367_v36 = vmul.f32 0.0078125, %v356_v27  ;;  %v380_v37 = vmul.f32 %v373_v34, %v373_v34 }
 0x2b4   :  { %v981_v38 = vsub.f32 %v345_v14, %v367_v36  ;;  %389 = vadd.xlane.f32.xlu1 %v380_v37 }
 0x2b5   :  { %v358_v35 = vpop.xlane.xlu0 %357 }
 0x2b6   :  { %v368_v39 = vmul.f32 0.0078125, %v358_v35  ;;  %v381_v40 = vmul.f32 %v981_v38, %v981_v38 }
 0x2b8   :  { %v985_v41 = vsub.f32 %v346_v17, %v368_v39  ;;  %391 = vadd.xlane.f32.xlu0 %v381_v40 }
 0x2b9   :  { %v360_v42 = vpop.xlane.xlu1 %359 }
 0x2ba   :  { %v369_v43 = vmul.f32 0.0078125, %v360_v42  ;;  %v382_v44 = vmul.f32 %v985_v41, %v985_v41 }
 0x2bc   :  { %v989_v45 = vsub.f32 %v347_v21, %v369_v43  ;;  %393 = vadd.xlane.f32.xlu1 %v382_v44 }
 0x2bd   :  { %v362_v46 = vpop.xlane.xlu0 %361 }
 0x2be   :  { %v370_v47 = vmul.f32 0.0078125, %v362_v46  ;;  %v383_v48 = vmul.f32 %v989_v45, %v989_v45 }
 0x2c0   :  { %v993_v49 = vsub.f32 %v348_v24, %v370_v47  ;;  %395 = vadd.xlane.f32.xlu0 %v383_v48 }
 0x2c2   :  { %v384_v50 = vmul.f32 %v993_v49, %v993_v49 }
 0x2c4   :  { %397 = vadd.xlane.f32.xlu1 %v384_v50 }
 0x339   :  { %v386_v51 = vpop.xlane.xlu1 %385 }
 0x33a   :  { %v399_v52 = vmul.f32 0.0078125, %v386_v51 }
 0x33c   :  { %v406_v53 = vadd.f32 1e-05, %v399_v52 }
 0x33d   :  { %v388_v54 = vpop.xlane.xlu0 %387 }
 0x33e   :  { %697 = vrsqrt.f32 %v406_v53  ;;  %v400_v55 = vmul.f32 0.0078125, %v388_v54 }
 0x340   :  { %v407_v56 = vadd.f32 1e-05, %v400_v55 }
 0x341   :  { %v390_v57 = vpop.xlane.xlu1 %389 }
 0x342   :  { %699 = vrsqrt.f32 %v407_v56  ;;  %v401_v59 = vmul.f32 0.0078125, %v390_v57 }
 0x344   :  { %v408_v62 = vadd.f32 1e-05, %v401_v59 }
 0x345   :  { %v392_v2 = vpop.xlane.xlu0 %391 }
 0x346   :  { %701 = vrsqrt.f32 %v408_v62  ;;  %v402_v3 = vmul.f32 0.0078125, %v392_v2 }
 0x348   :  { %v698_v6 = vpop.eup %697  ;;  %v409_v7 = vadd.f32 1e-05, %v402_v3 }
 0x349   :  { %v420_v9 = vmul.f32 %v698_v6, %v371_v26  ;;  %v394_v10 = vpop.xlane.xlu1 %393 }
 0x34a   :  { %703 = vrsqrt.f32 %v409_v7  ;;  %v403_v11 = vmul.f32 0.0078125, %v394_v10 }
 0x34b   :  { %v431_v13 = vmul.f32 %v430_v5, %v420_v9 }
 0x34c   :  { %v700_v14 = vpop.eup %699  ;;  %v410_v15 = vadd.f32 1e-05, %v403_v11 }
 0x34d   :  { %v442_v63 = vadd.f32 %v441_v1, %v431_v13  ;;  %v421_v16 = vmul.f32 %v700_v14, %v372_v19  ;;  %v396_v17 = vpop.xlane.xlu0 %395 }
 0x34e   :  { %705 = vrsqrt.f32 %v410_v15  ;;  %v404_v58 = vmul.f32 0.0078125, %v396_v17 }
 0x34f   :  { %449 = vst [vmem:[#allocation8] sm:$0xff] %v442_v63  ;;  %v432_v18 = vmul.f32 %v430_v5, %v421_v16 }
 0x350   :  { %v702_v4 = vpop.eup %701  ;;  %v411_v20 = vadd.f32 1e-05, %v404_v58 }
 0x351   :  { %v443_v21 = vadd.f32 %v441_v1, %v432_v18  ;;  %v422_v22 = vmul.f32 %v702_v4, %v373_v34  ;;  %v398_v8 = vpop.xlane.xlu1 %397 }
 0x352   :  { %707 = vrsqrt.f32 %v411_v20  ;;  %v405_v60 = vmul.f32 0.0078125, %v398_v8 }
 0x353   :  { %450 = vst [vmem:[#allocation8 + $0x8] sm:$0xff] %v443_v21  ;;  %v433_v23 = vmul.f32 %v430_v5, %v422_v22 }
 0x354   :  { %v704_v24 = vpop.eup %703  ;;  %v412_v12 = vadd.f32 1e-05, %v405_v60 }
 0x355   :  { %v444_v25 = vadd.f32 %v441_v1, %v433_v23  ;;  %v423_v26 = vmul.f32 %v704_v24, %v981_v38 }
 0x356   :  { %709 = vrsqrt.f32 %v412_v12 }
 0x357   :  { %451 = vst [vmem:[#allocation8 + $0x10] sm:$0xff] %v444_v25  ;;  %v434_v28 = vmul.f32 %v430_v5, %v423_v26 }
 0x358   :  { %v706_v29 = vpop.eup %705 }
 0x359   :  { %v445_v30 = vadd.f32 %v441_v1, %v434_v28  ;;  %v424_v19 = vmul.f32 %v706_v29, %v985_v41 }
 0x35b   :  { %452 = vst [vmem:[#allocation8 + $0x18] sm:$0xff] %v445_v30  ;;  %v435_v31 = vmul.f32 %v430_v5, %v424_v19 }
 0x35c   :  { %v708_v32 = vpop.eup %707 }
 0x35d   :  { %v446_v33 = vadd.f32 %v441_v1, %v435_v31  ;;  %v425_v34 = vmul.f32 %v708_v32, %v989_v45 }
 0x35f   :  { %453 = vst [vmem:[#allocation8 + $0x20] sm:$0xff] %v446_v33  ;;  %v436_v27 = vmul.f32 %v430_v5, %v425_v34 }
 0x360   :  { %v710_v36 = vpop.eup %709 }
 0x361   :  { %v447_v37 = vadd.f32 %v441_v1, %v436_v27  ;;  %v426_v35 = vmul.f32 %v710_v36, %v993_v49 }
 0x363   :  { %454 = vst [vmem:[#allocation8 + $0x28] sm:$0xff] %v447_v37  ;;  %v437_v38 = vmul.f32 %v430_v5, %v426_v35 }
 0x365   :  { %v448_v39 = vadd.f32 %v441_v1, %v437_v38 }
 0x367   :  { %455 = vst [vmem:[#allocation8 + $0x30] sm:$0xff] %v448_v39 }
 0x368   :  { %788 = shalt.err (!%p785_p0)
}
 0x369   :  { %s789_s6 = scalar_lea.hbm %s1024_s4, 896 }
 0x36a   :  { %p790_p1 = scmp.ne.s32.totalorder %s1024_s4, %s789_s6  ;;  %p793_p2 = scmp.lt.u32.totalorder %s789_s6, %s1024_s4 }
 0x36c   :  { %p795_p3 = pnand %p793_p2, %p790_p1 }
 0x36e   :  { %798 = shalt.err (!%p795_p3)
}
 0x36f   :  { %467 = dma.vmem_to_hbm [thread:$0]  %s462_s26, 896, %s1024_s4, [#allocation4], %s807_s27, %s807_s27, %s808_s28  }
 0x370   :  { %803 = dma.done.wait [#allocation4], 896  }
 0x371   :  { %804 = vsyncadd [#allocation4], 4294966400 }
 0x372   :  { %471 = vsyncpa [#allocation3], 1 }
 0x373   :  { %472 = vsyncpa [#allocation6], 1 }
 0x374   :  { %473 = vsyncpa [#allocation4], 1 }

// kernel: tpu_custom_call.1
= control target key start
LH: loop header
LB: loop body
LE: loop exit
PB: predicated region body
PF: predicated region fallthrough
CT: control target
= control target key end

     0   :  { %9 = vsyncpa [#allocation3], 0  ;;  %s1020_s0 = inlined_call_operand.hbm [shape: f32[56,128], index: 0, kind: input, shape index: {}]   ;;  %s1021_s1 = inlined_call_operand.hbm [shape: f32[128,128], index: 1, kind: input, shape index: {}]   ;;  %s1022_s2 = inlined_call_operand.hbm [shape: f32[128,128], index: 2, kind: input, shape index: {}]   ;;  %s1023_s3 = inlined_call_operand.vmem [shape: f32[4,128], index: 3, kind: input, shape index: {}]   ;;  %s1024_s4 = inlined_call_operand.hbm [shape: f32[56,128], index: 4, kind: output, shape index: {}]  }
   0x1   :  { %10 = vsyncpa [#allocation6], 0 }
   0x2   :  { %11 = vsyncpa [#allocation4], 0  ;;  %s805_s15 = smov [#allocation5]   ;;  %s806_s17 = smov [#allocation2]  }
   0x3   :  { %s29_s16 = sshll.u32 %s805_s15, 4  ;;  %s17_s18 = sshll.u32 %s806_s17, 4  ;;  %s30_s16 = int_to_ptr.vmem [resolvable:$true] %s29_s16  ;;  %s839_s18 = int_to_ptr.vmem [resolvable:$true] %s17_s18 }
   0x4   :  { %s711_s21 = scalar_lea.hbm %s1021_s1, 2048 }
   0x5   :  { %p712_p0 = scmp.ne.s32.totalorder %s1021_s1, %s711_s21  ;;  %p715_p1 = scmp.lt.u32.totalorder %s711_s21, %s1021_s1 }
   0x7   :  { %p717_p2 = pnand %p715_p1, %p712_p0 }
   0x9   :  { %720 = shalt.err (!%p717_p2)
}
   0xa   :  { %s721_s26 = scalar_lea.vmem %s30_s16, 2048  ;;  %p726_p4 = scmp.lt.s32.totalorder %s30_s16, %s30_s16 }
   0xb   :  { %p722_p3 = scmp.ne.s32.totalorder %s30_s16, %s721_s26  ;;  %p727_p5 = scmp.lt.s32.totalorder %s721_s26, %s721_s26 }
   0xd   :  { %p728_p6 = por %p727_p5, %p726_p4 }
   0xf   :  { %p729_p7 = pnand %p728_p6, %p722_p3 }
  0x11   :  { %732 = shalt.err (!%p729_p7)
}
  0x12   :  { %s807_s27 = smov 128   ;;  %s808_s28 = smov 8  }
  0x13   :  { %35 = dma.hbm_to_vmem [thread:$0]  %s1021_s1, 2048, %s30_s16, [#allocation6], %s807_s27, %s807_s27, %s808_s28  }
  0x14   :  { %s733_s7 = scalar_lea.hbm %s1020_s0, 896 }
  0x15   :  { %p734_p8 = scmp.ne.s32.totalorder %s1020_s0, %s733_s7  ;;  %p737_p9 = scmp.lt.u32.totalorder %s733_s7, %s1020_s0 }
  0x17   :  { %p739_p10 = pnand %p737_p9, %p734_p8 }
  0x19   :  { %742 = shalt.err (!%p739_p10)
}
  0x1a   :  { %s743_s12 = scalar_lea.vmem %s839_s18, 896  ;;  %p748_p12 = scmp.lt.s32.totalorder %s839_s18, %s839_s18 }
  0x1b   :  { %p744_p11 = scmp.ne.s32.totalorder %s839_s18, %s743_s12  ;;  %p749_p13 = scmp.lt.s32.totalorder %s743_s12, %s743_s12 }
  0x1d   :  { %p750_p0 = por %p749_p13, %p748_p12 }
  0x1f   :  { %p751_p1 = pnand %p750_p0, %p744_p11 }
  0x21   :  { %754 = shalt.err (!%p751_p1)
}
  0x22   :  { %23 = dma.hbm_to_vmem [thread:$0]  %s1020_s0, 896, %s839_s18, [#allocation3], %s807_s27, %s807_s27, %s808_s28  }
  0x23   :  { %s809_s14 = smov [#allocation7]   ;;  %s755_s19 = scalar_lea.hbm %s1022_s2, 2048 }
  0x24   :  { %s41_s15 = sshll.u32 %s809_s14, 4  ;;  %p756_p2 = scmp.ne.s32.totalorder %s1022_s2, %s755_s19  ;;  %s42_s15 = int_to_ptr.vmem [resolvable:$true] %s41_s15 }
  0x25   :  { %p759_p3 = scmp.lt.u32.totalorder %s755_s19, %s1022_s2 }
  0x27   :  { %p761_p4 = pnand %p759_p3, %p756_p2 }
  0x29   :  { %764 = shalt.err (!%p761_p4)
}
  0x2a   :  { %s765_s24 = scalar_lea.vmem %s42_s15, 2048  ;;  %p770_p6 = scmp.lt.s32.totalorder %s42_s15, %s42_s15 }
  0x2b   :  { %p766_p5 = scmp.ne.s32.totalorder %s42_s15, %s765_s24  ;;  %p771_p7 = scmp.lt.s32.totalorder %s765_s24, %s765_s24 }
  0x2d   :  { %p772_p8 = por %p771_p7, %p770_p6 }
  0x2f   :  { %p773_p9 = pnand %p772_p8, %p766_p5 }
  0x31   :  { %776 = shalt.err (!%p773_p9)
}
  0x32   :  { %47 = dma.hbm_to_vmem [thread:$0]  %s1022_s2, 2048, %s42_s15, [#allocation6], %s807_s27, %s807_s27, %s808_s28  }
  0x33   :  { %799 = dma.done.wait [#allocation3], 896  }
  0x34   :  { %800 = vsyncadd [#allocation3], 4294966400 }
  0x35   :  { %801 = dma.done.wait [#allocation6], 4096  }
  0x36   :  { %802 = vsyncadd [#allocation6], 4294963200  ;;  %v810_v0 = vmov 0.0|0.0   ;;  %vm811_vm0 = vmmov 0   ;;  %v812_v1 = vmov 0.0   ;;  %v67_v2 = vld [vmem:[#allocation5] sm:$0xff]  ;;  %v83_v57 = vlaneseq }
  0x37   :  { %626 = vmatprep.subr.bf16.mxu0 %v810_v0  ;;  %552 = vmatprep.mubr.msk.f32.mxu0 %vm811_vm0, %v812_v1  ;;  %v68_v3 = vld [vmem:[#allocation5 + $0x8] sm:$0xff]  ;;  %v69_v4 = vld [vmem:[#allocation5 + $0x10] sm:$0xff]  ;;  %v70_v6 = vld [vmem:[#allocation5 + $0x18] sm:$0xff] }
  0x38   :  { %650 = vmatprep.subr.bf16.mxu1 %v810_v0  ;;  %605 = vmatprep.mubr.msk.f32.mxu1 %vm811_vm0, %v812_v1  ;;  %v627_v5 = vpack.c.bf16 %v68_v3, %v67_v2  ;;  %v630_v7 = vpack.c.bf16 %v70_v6, %v69_v4  ;;  %v71_v8 = vld [vmem:[#allocation5 + $0x20] sm:$0xff]  ;;  %v72_v9 = vld [vmem:[#allocation5 + $0x28] sm:$0xff]  ;;  %v73_v11 = vld [vmem:[#allocation5 + $0x30] sm:$0xff]  ;;  %v923_v58 = vshrl.u32 %v83_v57, 7 }
  0x39   :  { %v633_v10 = vpack.c.bf16 %v72_v9, %v71_v8  ;;  %v74_v12 = vld [vmem:[#allocation5 + $0x38] sm:$0xff]  ;;  %v222_v13 = vld [vmem:[#allocation7] sm:$0xff]  ;;  %v223_v14 = vld [vmem:[#allocation7 + $0x8] sm:$0xff] }
  0x3a   :  { %628 = vmatpush3.bf16.msra.mxu0 %v627_v5  ;;  %v224_v15 = vld [vmem:[#allocation7 + $0x10] sm:$0xff]  ;;  %v225_v16 = vld [vmem:[#allocation7 + $0x18] sm:$0xff]  ;;  %v651_v17 = vpack.c.bf16 %v223_v14, %v222_v13  ;;  %v636_v18 = vpack.c.bf16 %v74_v12, %v73_v11  ;;  %v75_v19 = vld [vmem:[#allocation5 + $0x40] sm:$0xff]  ;;  %v85_v59 = vsub.s32 0, %v923_v58 }
  0x3b   :  { %629 = vmatprep.subr.bf16.mxu0 %v810_v0  ;;  %v654_v20 = vpack.c.bf16 %v225_v16, %v224_v15  ;;  %v76_v21 = vld [vmem:[#allocation5 + $0x48] sm:$0xff]  ;;  %v226_v22 = vld [vmem:[#allocation7 + $0x20] sm:$0xff]  ;;  %v77_v26 = vld [vmem:[#allocation5 + $0x50] sm:$0xff] }
  0x3c   :  { %652 = vmatpush3.bf16.msra.mxu1 %v651_v17  ;;  %v227_v23 = vld [vmem:[#allocation7 + $0x28] sm:$0xff]  ;;  %v639_v24 = vpack.c.bf16 %v76_v21, %v75_v19  ;;  %v78_v27 = vld [vmem:[#allocation5 + $0x58] sm:$0xff]  ;;  %v79_v29 = vld [vmem:[#allocation5 + $0x60] sm:$0xff] }
  0x3d   :  { %653 = vmatprep.subr.bf16.mxu1 %v810_v0  ;;  %v657_v25 = vpack.c.bf16 %v227_v23, %v226_v22  ;;  %v642_v28 = vpack.c.bf16 %v78_v27, %v77_v26  ;;  %v80_v30 = vld [vmem:[#allocation5 + $0x68] sm:$0xff]  ;;  %v81_v32 = vld [vmem:[#allocation5 + $0x70] sm:$0xff]  ;;  %v82_v33 = vld [vmem:[#allocation5 + $0x78] sm:$0xff] }
  0x3e   :  { %631 = vmatpush3.bf16.msra.mxu0 %v630_v7  ;;  %v645_v31 = vpack.c.bf16 %v80_v30, %v79_v29  ;;  %v648_v34 = vpack.c.bf16 %v82_v33, %v81_v32  ;;  %v60_v35 = vld [vmem:[#allocation2] sm:$0xff]  ;;  %v61_v36 = vld [vmem:[#allocation2 + $0x8] sm:$0xff]  ;;  %v62_v37 = vld [vmem:[#allocation2 + $0x10] sm:$0xff] }
  0x3f   :  { %632 = vmatprep.subr.bf16.mxu0 %v810_v0  ;;  %v63_v38 = vld [vmem:[#allocation2 + $0x18] sm:$0xff]  ;;  %v64_v39 = vld [vmem:[#allocation2 + $0x20] sm:$0xff]  ;;  %v65_v40 = vld [vmem:[#allocation2 + $0x28] sm:$0xff] }
  0x40   :  { %655 = vmatpush3.bf16.msra.mxu1 %v654_v20  ;;  %v66_v41 = vld [vmem:[#allocation2 + $0x30] sm:$0xff]  ;;  %v228_v42 = vld [vmem:[#allocation7 + $0x30] sm:$0xff]  ;;  %v230_v45 = vld [vmem:[#allocation7 + $0x40] sm:$0xff] }
  0x41   :  { %656 = vmatprep.subr.bf16.mxu1 %v810_v0  ;;  %v229_v43 = vld [vmem:[#allocation7 + $0x38] sm:$0xff]  ;;  %v231_v46 = vld [vmem:[#allocation7 + $0x48] sm:$0xff]  ;;  %v232_v48 = vld [vmem:[#allocation7 + $0x50] sm:$0xff] }
  0x42   :  { %634 = vmatpush3.bf16.msra.mxu0 %v633_v10  ;;  %v660_v44 = vpack.c.bf16 %v229_v43, %v228_v42  ;;  %v663_v47 = vpack.c.bf16 %v231_v46, %v230_v45  ;;  %v233_v49 = vld [vmem:[#allocation7 + $0x58] sm:$0xff]  ;;  %v234_v51 = vld [vmem:[#allocation7 + $0x60] sm:$0xff]  ;;  %v235_v52 = vld [vmem:[#allocation7 + $0x68] sm:$0xff] }
  0x43   :  { %635 = vmatprep.subr.bf16.mxu0 %v810_v0  ;;  %v666_v50 = vpack.c.bf16 %v233_v49, %v232_v48  ;;  %v669_v53 = vpack.c.bf16 %v235_v52, %v234_v51  ;;  %v236_v54 = vld [vmem:[#allocation7 + $0x70] sm:$0xff]  ;;  %v237_v55 = vld [vmem:[#allocation7 + $0x78] sm:$0xff]  ;;  %v929_v60 = vld [vmem:[%s1023_s3] sm:$0xf]  ;;  %s813_s3 = smov [#allocation8]  }
  0x44   :  { %658 = vmatpush3.bf16.msra.mxu1 %v657_v25  ;;  %v672_v56 = vpack.c.bf16 %v237_v55, %v236_v54  ;;  %v86_v61 = vrot.slane %v929_v60, %v85_v59  ;;  %v240_v55 = vsub.s32 1, %v923_v58  ;;  %s461_s26 = sshll.u32 %s813_s3, 4  ;;  %s462_s26 = int_to_ptr.vmem [resolvable:$true] %s461_s26 }
  0x45   :  { %659 = vmatprep.subr.bf16.mxu1 %v810_v0  ;;  %s777_s29 = scalar_lea.vmem %s462_s26, 896  ;;  %p782_p11 = scmp.lt.s32.totalorder %s462_s26, %s462_s26 }
  0x46   :  { %637 = vmatpush3.bf16.msra.mxu0 %v636_v18  ;;  %p778_p10 = scmp.ne.s32.totalorder %s462_s26, %s777_s29  ;;  %p783_p12 = scmp.lt.s32.totalorder %s777_s29, %s777_s29 }
  0x47   :  { %638 = vmatprep.subr.bf16.mxu0 %v810_v0 }
  0x48   :  { %661 = vmatpush3.bf16.msra.mxu1 %v660_v44  ;;  %p784_p13 = por %p783_p12, %p782_p11 }
  0x49   :  { %662 = vmatprep.subr.bf16.mxu1 %v810_v0 }
  0x4a   :  { %640 = vmatpush3.bf16.msra.mxu0 %v639_v24  ;;  %p785_p0 = pnand %p784_p13, %p778_p10 }
  0x4b   :  { %641 = vmatprep.subr.bf16.mxu0 %v810_v0 }
  0x4c   :  { %664 = vmatpush3.bf16.msra.mxu1 %v663_v47 }
  0x4d   :  { %665 = vmatprep.subr.bf16.mxu1 %v810_v0 }
  0x4e   :  { %643 = vmatpush3.bf16.msra.mxu0 %v642_v28 }
  0x4f   :  { %644 = vmatprep.subr.bf16.mxu0 %v810_v0 }
  0x50   :  { %667 = vmatpush3.bf16.msra.mxu1 %v666_v50 }
  0x51   :  { %668 = vmatprep.subr.bf16.mxu1 %v810_v0 }
  0x52   :  { %646 = vmatpush3.bf16.msra.mxu0 %v645_v31 }
  0x53   :  { %647 = vmatprep.subr.bf16.mxu0 %v810_v0 }
  0x54   :  { %670 = vmatpush3.bf16.msra.mxu1 %v669_v53 }
  0x55   :  { %671 = vmatprep.subr.bf16.mxu1 %v810_v0 }
  0x56   :  { %649 = vmatpush3.bf16.msra.mxu0 %v648_v34 }
  0x58   :  { %673 = vmatpush3.bf16.msra.mxu1 %v672_v56  ;;  %v241_v56 = vrot.slane %v929_v60, %v240_v55 }
  0x59   :  { %553 = vmatmul.mubr.f32.vlgmr.msra.gmra.mrb[0].mxu0 %v60_v35 }
  0x5a   :  { %555 = vmatprep.mubr.msk.f32.mxu0 %vm811_vm0, %v812_v1 }
  0x5d   :  { %556 = vmatmul.mubr.f32.gmra.mrb[2].mxu0 %v61_v36 }
  0x5e   :  { %558 = vmatprep.mubr.msk.f32.mxu0 %vm811_vm0, %v812_v1 }
  0x61   :  { %559 = vmatmul.mubr.f32.gmra.mrb[4].mxu0 %v62_v37 }
  0x62   :  { %561 = vmatprep.mubr.msk.f32.mxu0 %vm811_vm0, %v812_v1 }
  0x65   :  { %562 = vmatmul.mubr.f32.gmra.mrb[6].mxu0 %v63_v38 }
  0x66   :  { %564 = vmatprep.mubr.msk.f32.mxu0 %vm811_vm0, %v812_v1 }
  0x69   :  { %565 = vmatmul.mubr.f32.gmra.mrb[8].mxu0 %v64_v39 }
  0x6a   :  { %567 = vmatprep.mubr.msk.f32.mxu0 %vm811_vm0, %v812_v1 }
  0x6d   :  { %568 = vmatmul.mubr.f32.gmra.mrb[10].mxu0 %v65_v40 }
  0x6e   :  { %570 = vmatprep.mubr.msk.f32.mxu0 %vm811_vm0, %v812_v1 }
  0x71   :  { %571 = vmatmul.mubr.f32.gmra.mrb[12].mxu0 %v66_v41 }
 0x12c   :  { %v153_v62 = vpop.f32.mrb[0].mxu0 }
 0x12d   :  { %v932_v63 = vadd.f32 %v153_v62, %v86_v61  ;;  %v554_v0 = vpop.f32.mrb[1].mxu0 }
 0x12f   :  { %v194_v2 = vmul.f32 0.70710677, %v932_v63  ;;  %v187_v16 = vmul.f32 0.5, %v932_v63 }
 0x130   :  { %v158_v3 = vpop.f32.mrb[2].mxu0 }
 0x131   :  { %683 = verf.f32 %v194_v2  ;;  %v935_v4 = vadd.f32 %v158_v3, %v86_v61  ;;  %v557_v5 = vpop.f32.mrb[3].mxu0 }
 0x133   :  { %v195_v6 = vmul.f32 0.70710677, %v935_v4  ;;  %v188_v24 = vmul.f32 0.5, %v935_v4 }
 0x134   :  { %v163_v7 = vpop.f32.mrb[4].mxu0 }
 0x135   :  { %685 = verf.f32 %v195_v6  ;;  %v938_v8 = vadd.f32 %v163_v7, %v86_v61  ;;  %v560_v9 = vpop.f32.mrb[5].mxu0 }
 0x137   :  { %v196_v10 = vmul.f32 0.70710677, %v938_v8  ;;  %v189_v32 = vmul.f32 0.5, %v938_v8 }
 0x138   :  { %v168_v11 = vpop.f32.mrb[6].mxu0 }
 0x139   :  { %687 = verf.f32 %v196_v10  ;;  %v941_v12 = vadd.f32 %v168_v11, %v86_v61  ;;  %v563_v13 = vpop.f32.mrb[7].mxu0 }
 0x13b   :  { %v684_v14 = vpop.eup %683  ;;  %v197_v15 = vmul.f32 0.70710677, %v941_v12  ;;  %v190_v40 = vmul.f32 0.5, %v941_v12 }
 0x13c   :  { %v173_v17 = vpop.f32.mrb[8].mxu0  ;;  %v208_v18 = vadd.f32 1.0, %v684_v14 }
 0x13d   :  { %689 = verf.f32 %v197_v15  ;;  %v945_v19 = vadd.f32 %v173_v17, %v86_v61  ;;  %v566_v20 = vpop.f32.mrb[9].mxu0 }
 0x13e   :  { %v215_v21 = vmul.f32 %v208_v18, %v187_v16 }
 0x13f   :  { %v686_v22 = vpop.eup %685  ;;  %v198_v23 = vmul.f32 0.70710677, %v945_v19  ;;  %v191_v44 = vmul.f32 0.5, %v945_v19 }
 0x140   :  { %v178_v25 = vpop.f32.mrb[10].mxu0  ;;  %606 = vmatmul.mubr.f32.vlgmr.msra.gmra.mrb[0].mxu1 %v215_v21  ;;  %v209_v26 = vadd.f32 1.0, %v686_v22 }
 0x141   :  { %691 = verf.f32 %v198_v23  ;;  %v949_v27 = vadd.f32 %v178_v25, %v86_v61  ;;  %v569_v28 = vpop.f32.mrb[11].mxu0  ;;  %608 = vmatprep.mubr.msk.f32.mxu1 %vm811_vm0, %v812_v1 }
 0x142   :  { %v216_v29 = vmul.f32 %v209_v26, %v188_v24 }
 0x143   :  { %v688_v30 = vpop.eup %687  ;;  %v199_v31 = vmul.f32 0.70710677, %v949_v27  ;;  %v192_v48 = vmul.f32 0.5, %v949_v27 }
 0x144   :  { %v183_v33 = vpop.f32.mrb[12].mxu0  ;;  %609 = vmatmul.mubr.f32.gmra.mrb[2].mxu1 %v216_v29  ;;  %v210_v34 = vadd.f32 1.0, %v688_v30 }
 0x145   :  { %693 = verf.f32 %v199_v31  ;;  %v955_v35 = vadd.f32 %v183_v33, %v86_v61  ;;  %v572_v36 = vpop.f32.mrb[13].mxu0  ;;  %611 = vmatprep.mubr.msk.f32.mxu1 %vm811_vm0, %v812_v1 }
 0x146   :  { %v217_v37 = vmul.f32 %v210_v34, %v189_v32 }
 0x147   :  { %v690_v38 = vpop.eup %689  ;;  %v200_v39 = vmul.f32 0.70710677, %v955_v35  ;;  %v193_v52 = vmul.f32 0.5, %v955_v35 }
 0x148   :  { %612 = vmatmul.mubr.f32.gmra.mrb[4].mxu1 %v217_v37  ;;  %v211_v41 = vadd.f32 1.0, %v690_v38 }
 0x149   :  { %695 = verf.f32 %v200_v39  ;;  %614 = vmatprep.mubr.msk.f32.mxu1 %vm811_vm0, %v812_v1 }
 0x14a   :  { %v218_v42 = vmul.f32 %v211_v41, %v190_v40 }
 0x14b   :  { %v692_v43 = vpop.eup %691 }
 0x14c   :  { %615 = vmatmul.mubr.f32.gmra.mrb[6].mxu1 %v218_v42  ;;  %v212_v45 = vadd.f32 1.0, %v692_v43 }
 0x14d   :  { %617 = vmatprep.mubr.msk.f32.mxu1 %vm811_vm0, %v812_v1 }
 0x14e   :  { %v219_v46 = vmul.f32 %v212_v45, %v191_v44 }
 0x14f   :  { %v694_v47 = vpop.eup %693 }
 0x150   :  { %618 = vmatmul.mubr.f32.gmra.mrb[8].mxu1 %v219_v46  ;;  %v213_v49 = vadd.f32 1.0, %v694_v47 }
 0x151   :  { %620 = vmatprep.mubr.msk.f32.mxu1 %vm811_vm0, %v812_v1 }
 0x152   :  { %v220_v50 = vmul.f32 %v213_v49, %v192_v48 }
 0x153   :  { %v696_v51 = vpop.eup %695 }
 0x154   :  { %621 = vmatmul.mubr.f32.gmra.mrb[10].mxu1 %v220_v50  ;;  %v214_v53 = vadd.f32 1.0, %v696_v51 }
 0x155   :  { %623 = vmatprep.mubr.msk.f32.mxu1 %vm811_vm0, %v812_v1 }
 0x156   :  { %v221_v54 = vmul.f32 %v214_v53, %v193_v52 }
 0x158   :  { %624 = vmatmul.mubr.f32.gmra.mrb[12].mxu1 %v221_v54 }
 0x213   :  { %v308_v57 = vpop.f32.mrb[0].mxu1 }
 0x214   :  { %v309_v59 = vadd.f32 %v308_v57, %v241_v56  ;;  %v607_v61 = vpop.f32.mrb[1].mxu1 }
 0x215   :  { %v429_v61 = vsub.s32 2, %v923_v58 }
 0x216   :  { %v342_v62 = vadd.f32 %v309_v59, %v932_v63 }
 0x217   :  { %v313_v0 = vpop.f32.mrb[2].mxu1 }
 0x218   :  { %v314_v2 = vadd.f32 %v313_v0, %v241_v56  ;;  %349 = vadd.xlane.f32.xlu0 %v342_v62  ;;  %v610_v3 = vpop.f32.mrb[3].mxu1  ;;  %v440_v0 = vsub.s32 3, %v923_v58 }
 0x21a   :  { %v343_v5 = vadd.f32 %v314_v2, %v935_v4 }
 0x21b   :  { %v318_v6 = vpop.f32.mrb[4].mxu1 }
 0x21c   :  { %v319_v7 = vadd.f32 %v318_v6, %v241_v56  ;;  %351 = vadd.xlane.f32.xlu0 %v343_v5  ;;  %v613_v1 = vpop.f32.mrb[5].mxu1 }
 0x21d   :  { %v441_v1 = vrot.slane %v929_v60, %v440_v0 }
 0x21e   :  { %v344_v9 = vadd.f32 %v319_v7, %v938_v8 }
 0x21f   :  { %v323_v10 = vpop.f32.mrb[6].mxu1 }
 0x220   :  { %v324_v11 = vadd.f32 %v323_v10, %v241_v56  ;;  %353 = vadd.xlane.f32.xlu1 %v344_v9  ;;  %v616_v13 = vpop.f32.mrb[7].mxu1 }
 0x222   :  { %v345_v14 = vadd.f32 %v324_v11, %v941_v12 }
 0x223   :  { %v328_v15 = vpop.f32.mrb[8].mxu1 }
 0x224   :  { %v329_v63 = vadd.f32 %v328_v15, %v241_v56  ;;  %355 = vadd.xlane.f32.xlu1 %v345_v14  ;;  %v619_v16 = vpop.f32.mrb[9].mxu1 }
 0x226   :  { %v346_v17 = vadd.f32 %v329_v63, %v945_v19 }
 0x227   :  { %v333_v18 = vpop.f32.mrb[10].mxu1 }
 0x228   :  { %v334_v4 = vadd.f32 %v333_v18, %v241_v56  ;;  %357 = vadd.xlane.f32.xlu0 %v346_v17  ;;  %v622_v20 = vpop.f32.mrb[11].mxu1 }
 0x22a   :  { %v347_v21 = vadd.f32 %v334_v4, %v949_v27 }
 0x22b   :  { %v338_v22 = vpop.f32.mrb[12].mxu1 }
 0x22c   :  { %v339_v8 = vadd.f32 %v338_v22, %v241_v56  ;;  %359 = vadd.xlane.f32.xlu1 %v347_v21  ;;  %v625_v23 = vpop.f32.mrb[13].mxu1 }
 0x22e   :  { %v348_v24 = vadd.f32 %v339_v8, %v955_v35 }
 0x230   :  { %361 = vadd.xlane.f32.xlu0 %v348_v24 }
 0x2a5   :  { %v350_v12 = vpop.xlane.xlu0 %349 }
 0x2a6   :  { %v364_v25 = vmul.f32 0.0078125, %v350_v12 }
 0x2a8   :  { %v371_v26 = vsub.f32 %v342_v62, %v364_v25 }
 0x2a9   :  { %v352_v28 = vpop.xlane.xlu0 %351 }
 0x2aa   :  { %v365_v29 = vmul.f32 0.0078125, %v352_v28  ;;  %v378_v30 = vmul.f32 %v371_v26, %v371_v26 }
 0x2ac   :  { %v372_v19 = vsub.f32 %v343_v5, %v365_v29  ;;  %385 = vadd.xlane.f32.xlu1 %v378_v30  ;;  %v430_v5 = vrot.slane %v929_v60, %v429_v61 }
 0x2ad   :  { %v354_v31 = vpop.xlane.xlu1 %353 }
 0x2ae   :  { %v366_v32 = vmul.f32 0.0078125, %v354_v31  ;;  %v379_v33 = vmul.f32 %v372_v19, %v372_v19 }
 0x2b0   :  { %v373_v34 = vsub.f32 %v344_v9, %v366_v32  ;;  %387 = vadd.xlane.f32.xlu0 %v379_v33 }
 0x2b1   :  { %v356_v27 = vpop.xlane.xlu1 %355 }
 0x2b2   :  { %v367_v36 = vmul.f32 0.0078125, %v356_v27  ;;  %v380_v37 = vmul.f32 %v373_v34, %v373_v34 }
 0x2b4   :  { %v981_v38 = vsub.f32 %v345_v14, %v367_v36  ;;  %389 = vadd.xlane.f32.xlu1 %v380_v37 }
 0x2b5   :  { %v358_v35 = vpop.xlane.xlu0 %357 }
 0x2b6   :  { %v368_v39 = vmul.f32 0.0078125, %v358_v35  ;;  %v381_v40 = vmul.f32 %v981_v38, %v981_v38 }
 0x2b8   :  { %v985_v41 = vsub.f32 %v346_v17, %v368_v39  ;;  %391 = vadd.xlane.f32.xlu0 %v381_v40 }
 0x2b9   :  { %v360_v42 = vpop.xlane.xlu1 %359 }
 0x2ba   :  { %v369_v43 = vmul.f32 0.0078125, %v360_v42  ;;  %v382_v44 = vmul.f32 %v985_v41, %v985_v41 }
 0x2bc   :  { %v989_v45 = vsub.f32 %v347_v21, %v369_v43  ;;  %393 = vadd.xlane.f32.xlu1 %v382_v44 }
 0x2bd   :  { %v362_v46 = vpop.xlane.xlu0 %361 }
 0x2be   :  { %v370_v47 = vmul.f32 0.0078125, %v362_v46  ;;  %v383_v48 = vmul.f32 %v989_v45, %v989_v45 }
 0x2c0   :  { %v993_v49 = vsub.f32 %v348_v24, %v370_v47  ;;  %395 = vadd.xlane.f32.xlu0 %v383_v48 }
 0x2c2   :  { %v384_v50 = vmul.f32 %v993_v49, %v993_v49 }
 0x2c4   :  { %397 = vadd.xlane.f32.xlu1 %v384_v50 }
 0x339   :  { %v386_v51 = vpop.xlane.xlu1 %385 }
 0x33a   :  { %v399_v52 = vmul.f32 0.0078125, %v386_v51 }
 0x33c   :  { %v406_v53 = vadd.f32 1e-05, %v399_v52 }
 0x33d   :  { %v388_v54 = vpop.xlane.xlu0 %387 }
 0x33e   :  { %697 = vrsqrt.f32 %v406_v53  ;;  %v400_v55 = vmul.f32 0.0078125, %v388_v54 }
 0x340   :  { %v407_v56 = vadd.f32 1e-05, %v400_v55 }
 0x341   :  { %v390_v57 = vpop.xlane.xlu1 %389 }
 0x342   :  { %699 = vrsqrt.f32 %v407_v56  ;;  %v401_v59 = vmul.f32 0.0078125, %v390_v57 }
 0x344   :  { %v408_v62 = vadd.f32 1e-05, %v401_v59 }
 0x345   :  { %v392_v2 = vpop.xlane.xlu0 %391 }
 0x346   :  { %701 = vrsqrt.f32 %v408_v62  ;;  %v402_v3 = vmul.f32 0.0078125, %v392_v2 }
 0x348   :  { %v698_v6 = vpop.eup %697  ;;  %v409_v7 = vadd.f32 1e-05, %v402_v3 }
 0x349   :  { %v420_v9 = vmul.f32 %v698_v6, %v371_v26  ;;  %v394_v10 = vpop.xlane.xlu1 %393 }
 0x34a   :  { %703 = vrsqrt.f32 %v409_v7  ;;  %v403_v11 = vmul.f32 0.0078125, %v394_v10 }
 0x34b   :  { %v431_v13 = vmul.f32 %v430_v5, %v420_v9 }
 0x34c   :  { %v700_v14 = vpop.eup %699  ;;  %v410_v15 = vadd.f32 1e-05, %v403_v11 }
 0x34d   :  { %v442_v63 = vadd.f32 %v441_v1, %v431_v13  ;;  %v421_v16 = vmul.f32 %v700_v14, %v372_v19  ;;  %v396_v17 = vpop.xlane.xlu0 %395 }
 0x34e   :  { %705 = vrsqrt.f32 %v410_v15  ;;  %v404_v58 = vmul.f32 0.0078125, %v396_v17 }
 0x34f   :  { %449 = vst [vmem:[#allocation8] sm:$0xff] %v442_v63  ;;  %v432_v18 = vmul.f32 %v430_v5, %v421_v16 }
 0x350   :  { %v702_v4 = vpop.eup %701  ;;  %v411_v20 = vadd.f32 1e-05, %v404_v58 }
 0x351   :  { %v443_v21 = vadd.f32 %v441_v1, %v432_v18  ;;  %v422_v22 = vmul.f32 %v702_v4, %v373_v34  ;;  %v398_v8 = vpop.xlane.xlu1 %397 }
 0x352   :  { %707 = vrsqrt.f32 %v411_v20  ;;  %v405_v60 = vmul.f32 0.0078125, %v398_v8 }
 0x353   :  { %450 = vst [vmem:[#allocation8 + $0x8] sm:$0xff] %v443_v21  ;;  %v433_v23 = vmul.f32 %v430_v5, %v422_v22 }
 0x354   :  { %v704_v24 = vpop.eup %703  ;;  %v412_v12 = vadd.f32 1e-05, %v405_v60 }
 0x355   :  { %v444_v25 = vadd.f32 %v441_v1, %v433_v23  ;;  %v423_v26 = vmul.f32 %v704_v24, %v981_v38 }
 0x356   :  { %709 = vrsqrt.f32 %v412_v12 }
 0x357   :  { %451 = vst [vmem:[#allocation8 + $0x10] sm:$0xff] %v444_v25  ;;  %v434_v28 = vmul.f32 %v430_v5, %v423_v26 }
 0x358   :  { %v706_v29 = vpop.eup %705 }
 0x359   :  { %v445_v30 = vadd.f32 %v441_v1, %v434_v28  ;;  %v424_v19 = vmul.f32 %v706_v29, %v985_v41 }
 0x35b   :  { %452 = vst [vmem:[#allocation8 + $0x18] sm:$0xff] %v445_v30  ;;  %v435_v31 = vmul.f32 %v430_v5, %v424_v19 }
 0x35c   :  { %v708_v32 = vpop.eup %707 }
 0x35d   :  { %v446_v33 = vadd.f32 %v441_v1, %v435_v31  ;;  %v425_v34 = vmul.f32 %v708_v32, %v989_v45 }
 0x35f   :  { %453 = vst [vmem:[#allocation8 + $0x20] sm:$0xff] %v446_v33  ;;  %v436_v27 = vmul.f32 %v430_v5, %v425_v34 }
 0x360   :  { %v710_v36 = vpop.eup %709 }
 0x361   :  { %v447_v37 = vadd.f32 %v441_v1, %v436_v27  ;;  %v426_v35 = vmul.f32 %v710_v36, %v993_v49 }
 0x363   :  { %454 = vst [vmem:[#allocation8 + $0x28] sm:$0xff] %v447_v37  ;;  %v437_v38 = vmul.f32 %v430_v5, %v426_v35 }
 0x365   :  { %v448_v39 = vadd.f32 %v441_v1, %v437_v38 }
 0x367   :  { %455 = vst [vmem:[#allocation8 + $0x30] sm:$0xff] %v448_v39 }
 0x368   :  { %788 = shalt.err (!%p785_p0)
}
 0x369   :  { %s789_s6 = scalar_lea.hbm %s1024_s4, 896 }
 0x36a   :  { %p790_p1 = scmp.ne.s32.totalorder %s1024_s4, %s789_s6  ;;  %p793_p2 = scmp.lt.u32.totalorder %s789_s6, %s1024_s4 }
 0x36c   :  { %p795_p3 = pnand %p793_p2, %p790_p1 }
 0x36e   :  { %798 = shalt.err (!%p795_p3)
}
 0x36f   :  { %467 = dma.vmem_to_hbm [thread:$0]  %s462_s26, 896, %s1024_s4, [#allocation4], %s807_s27, %s807_s27, %s808_s28  }
 0x370   :  { %803 = dma.done.wait [#allocation4], 896  }
 0x371   :  { %804 = vsyncadd [#allocation4], 4294966400 }
 0x372   :  { %471 = vsyncpa [#allocation3], 1 }
 0x373   :  { %472 = vsyncpa [#allocation6], 1 }
 0x374   :  { %473 = vsyncpa [#allocation4], 1 }

</bundles_post_ra>
